<compile_context>
chip_gen: v7x
topology: tpu7x:2x2x1
jax: 0.10.0
libtpu: 0.0.40
codegen_flags: <defaults>
</compile_context>

<pallas_src>
import math
import functools

import jax
import jax.numpy as jnp
from jax import lax
from jax.experimental import pallas as pl
from jax.experimental.pallas import tpu as pltpu

_MIB = 1024 * 1024


def _vmem_limit_bytes():
    """phys/2 (64 MiB on v5e/v6e, 32 MiB on v7x); 32 MiB safe floor if the query fails."""
    try:
        phys = int(pltpu.get_tpu_info().vmem_capacity_bytes)
        return max(32 * _MIB, phys // 2)
    except Exception:
        return 32 * _MIB


# ---------------------------------------------------------------------------
# Tiled linear (x @ w + b) — bf16 operands, f32 accumulation
# ---------------------------------------------------------------------------
def _pick_tile(dim, prefs):
    for p in prefs:
        if dim >= p and dim % p == 0:
            return p
    return dim  # fall back to full dimension (fine for small / unaligned shapes)


def _linear_bias_kernel(x_ref, w_ref, b_ref, o_ref, acc_ref):
    @pl.when(pl.program_id(2) == 0)
    def _init():
        acc_ref[...] = jnp.zeros_like(acc_ref)

    acc_ref[...] += jnp.dot(x_ref[...], w_ref[...],
                            preferred_element_type=jnp.float32)

    @pl.when(pl.program_id(2) == pl.num_programs(2) - 1)
    def _finalize():
        o_ref[...] = (acc_ref[...] + b_ref[...].astype(jnp.float32)).astype(o_ref.dtype)


def pallas_linear(x, w, b, out_dtype=jnp.float32):
    """x: (M, K) bf16, w: (K, N) bf16, b: (N,) f32  ->  (M, N) out_dtype."""
    M, K = x.shape
    K2, N = w.shape
    assert K == K2
    tm = _pick_tile(M, (512, 256, 128))
    tn = _pick_tile(N, (1024, 512, 256, 128))
    tk = _pick_tile(K, (512, 256, 128))
    grid = (M // tm, N // tn, K // tk)
    return pl.pallas_call(
        _linear_bias_kernel,
        out_shape=jax.ShapeDtypeStruct((M, N), out_dtype),
        grid=grid,
        in_specs=[
            pl.BlockSpec((tm, tk), lambda i, j, k: (i, k)),
            pl.BlockSpec((tk, tn), lambda i, j, k: (k, j)),
            pl.BlockSpec((1, tn), lambda i, j, k: (0, j)),
        ],
        out_specs=pl.BlockSpec((tm, tn), lambda i, j, k: (i, j)),
        scratch_shapes=[pltpu.VMEM((tm, tn), jnp.float32)],
        compiler_params=pltpu.CompilerParams(
            dimension_semantics=("parallel", "parallel", "arbitrary"),
            vmem_limit_bytes=_vmem_limit_bytes(),
        ),
    )(x, w, b.reshape(1, N).astype(jnp.float32))


# ---------------------------------------------------------------------------
# Sliding-window attention + fused overlap-average merge
# Grid: (batch, window).  One (W, 3*hidden) slab per window, all heads in-kernel.
# ---------------------------------------------------------------------------
def _sliding_attn_kernel(bias_ref, qkv_hbm, o_ref, slab_ref, sem, win_ref, acc_ref,
                         *, H, S, D, W, stride, n_regular, has_tail, aligned):
    hidden = H * D
    b = pl.program_id(0)
    w = pl.program_id(1)
    nw = pl.num_programs(1)

    def win_start(widx):
        # regular starts w*stride, tail start S-W (min() reproduces the module's start list)
        s0 = jnp.minimum(widx * stride, S - W)
        return pl.multiple_of(s0, 8) if aligned else s0

    def row_start(widx):
        r = b * S + win_start(widx)
        return pl.multiple_of(r, 8) if aligned else r

    slot = w % 2
    cur_copy = pltpu.make_async_copy(qkv_hbm.at[pl.ds(row_start(w), W), :],
                                     slab_ref.at[slot], sem.at[slot])

    @pl.when(w == 0)
    def _prime():
        cur_copy.start()                        # first window of this batch element
        acc_ref[...] = jnp.zeros_like(acc_ref)

    cur_copy.wait()

    @pl.when(w + 1 < nw)
    def _prefetch_next():                       # overlap next window's DMA with this compute
        pltpu.make_async_copy(qkv_hbm.at[pl.ds(row_start(w + 1), W), :],
                              slab_ref.at[1 - slot], sem.at[1 - slot]).start()

    # All heads read from the same resident slab (q | k | v column groups).
    for h in range(H):
        q = slab_ref[slot, :, h * D:(h + 1) * D]                       # scale folded into wq
        k = slab_ref[slot, :, hidden + h * D:hidden + (h + 1) * D]
        v = slab_ref[slot, :, 2 * hidden + h * D:2 * hidden + (h + 1) * D]
        s = lax.dot_general(q, k, (((1,), (1,)), ((), ())),
                            preferred_element_type=jnp.float32)        # (W, W), no k.T copy
        s = s + bias_ref[h].astype(jnp.float32)
        s = s - jnp.max(s, axis=-1, keepdims=True)
        p = jnp.exp(s)
        r = jnp.sum(p, axis=-1, keepdims=True)                         # (W, 1) f32
        o = jnp.dot(p.astype(v.dtype), v, preferred_element_type=jnp.float32)
        # Deferred softmax normalization: scale the (W, D) output, not the (W, W) probs.
        win_ref[:, h * D:(h + 1) * D] = o * pl.reciprocal(r, approx=True)

    s0 = win_start(w)
    acc_ref[pl.ds(s0, W), :] = acc_ref[pl.ds(s0, W), :] + win_ref[...]  # fused overlap-sum merge

    @pl.when(w == nw - 1)
    def _finalize():
        # Overlap-average 1/count from static thresholds (no (S,1) HBM input).
        posf = lax.broadcasted_iota(jnp.int32, (S, 1), 0).astype(jnp.float32)
        eps = 0.5 / float(stride)               # guards floor() against f32 division rounding
        lo = jnp.maximum(jnp.floor((posf - float(W)) / float(stride) + eps) + 1.0, 0.0)
        hi = jnp.minimum(jnp.floor(posf / float(stride) + eps), float(n_regular - 1))
        cnt = jnp.maximum(hi - lo + 1.0, 0.0)
        if has_tail:
            cnt = cnt + (posf >= float(S - W)).astype(jnp.float32)
        o_ref[...] = (acc_ref[...] / jnp.maximum(cnt, 1.0)).astype(o_ref.dtype)


def pallas_sliding_attention(qkv, pos_bias_bf16, *, B, H, S, D, W, stride,
                             n_windows, n_regular, has_tail):
    """qkv: (B*S, 3*hidden) bf16 in HBM -> (B, S, hidden) bf16 merged context (S,H,D order)."""
    hidden = H * D
    aligned = (stride % 8 == 0) and ((S - W) % 8 == 0) and (S % 8 == 0)
    kernel = functools.partial(
        _sliding_attn_kernel, H=H, S=S, D=D, W=W, stride=stride,
        n_regular=n_regular, has_tail=has_tail, aligned=aligned)
    return pl.pallas_call(
        kernel,
        out_shape=jax.ShapeDtypeStruct((B, S, hidden), jnp.bfloat16),
        grid=(B, n_windows),
        in_specs=[
            pl.BlockSpec((H, W, W), lambda b, w: (0, 0, 0)),   # pos_bias resident in VMEM
            pl.BlockSpec(memory_space=pl.ANY),                 # fused qkv stays in HBM
        ],
        out_specs=pl.BlockSpec((None, S, hidden), lambda b, w: (b, 0, 0)),
        scratch_shapes=[
            pltpu.VMEM((2, W, 3 * hidden), jnp.bfloat16),      # window slab double buffer
            pltpu.SemaphoreType.DMA((2,)),
            pltpu.VMEM((W, hidden), jnp.float32),              # lane-dense per-window staging
            pltpu.VMEM((S, hidden), jnp.float32),              # per-batch merge accumulator
        ],
        compiler_params=pltpu.CompilerParams(
            dimension_semantics=("parallel", "arbitrary"),
            vmem_limit_bytes=_vmem_limit_bytes(),
        ),
    )(pos_bias_bf16, qkv)


# ---------------------------------------------------------------------------
# Module wrapper
# ---------------------------------------------------------------------------
class SlidingWindowAttentionPallas:
    def __init__(self, hidden_size, num_heads, window_size=512, stride=256, key=None):
        assert hidden_size % num_heads == 0
        self.hidden_size = hidden_size
        self.num_heads = num_heads
        self.window_size = window_size
        self.stride = stride
        self.head_dim = hidden_size // num_heads

        key = jax.random.PRNGKey(0) if key is None else key
        ks = jax.random.split(key, 9)
        scl = 1.0 / math.sqrt(hidden_size)
        # f32 master weights (used by the pure-JAX reference); W = torch weight^T.
        self.wq = jax.random.uniform(ks[0], (hidden_size, hidden_size), jnp.float32, -scl, scl)
        self.bq = jax.random.uniform(ks[1], (hidden_size,), jnp.float32, -scl, scl)
        self.wk = jax.random.uniform(ks[2], (hidden_size, hidden_size), jnp.float32, -scl, scl)
        self.bk = jax.random.uniform(ks[3], (hidden_size,), jnp.float32, -scl, scl)
        self.wv = jax.random.uniform(ks[4], (hidden_size, hidden_size), jnp.float32, -scl, scl)
        self.bv = jax.random.uniform(ks[5], (hidden_size,), jnp.float32, -scl, scl)
        self.wo = jax.random.uniform(ks[6], (hidden_size, hidden_size), jnp.float32, -scl, scl)
        self.bo = jax.random.uniform(ks[7], (hidden_size,), jnp.float32, -scl, scl)
        # nn.Parameter(torch.zeros(H, W, W)); small random so the bias path is exercised.
        self.pos_bias = 0.02 * jax.random.normal(
            ks[8], (num_heads, window_size, window_size), jnp.float32)

        # bf16 copies fed to the MXU kernels; 1/sqrt(head_dim) folded into the q projection.
        attn_scale = 1.0 / math.sqrt(self.head_dim)
        self.w_qkv_bf16 = jnp.concatenate(
            [self.wq * attn_scale, self.wk, self.wv], axis=1).astype(jnp.bfloat16)
        self.b_qkv = jnp.concatenate([self.bq * attn_scale, self.bk, self.bv])
        self.wo_bf16 = self.wo.astype(jnp.bfloat16)
        self.pos_bias_bf16 = self.pos_bias.astype(jnp.bfloat16)

    def _merge_starts(self, S):
        W, stride = self.window_size, self.stride
        regular_starts = list(range(0, S - W + 1, stride))
        if S % stride != 0:
            return regular_starts + [max(0, S - W)]
        # Reference merges outputs[:-1] when there is no tail window.
        return regular_starts[:-1]

    def __call__(self, hidden_states, attention_mask=None):
        # TODO(synk): attention_mask masking path not implemented (module default mask=None).
        assert attention_mask is None
        B, S, Hd = hidden_states.shape
        assert Hd == self.hidden_size
        W, Hn, D, stride = self.window_size, self.num_heads, self.head_dim, self.stride
        assert S >= W, "sequence must be at least one window long"

        regular = list(range(0, S - W + 1, stride))
        has_tail = (S % stride != 0)
        n_regular = len(regular) if has_tail else len(regular) - 1
        n_windows = n_regular + (1 if has_tail else 0)
        assert n_windows > 0, "degenerate window configuration (no windows to merge)"

        # Fused QKV projection: one tiled GEMM, x streamed once, bf16 output kept in HBM.
        x2 = hidden_states.reshape(B * S, Hd).astype(jnp.bfloat16)
        qkv = pallas_linear(x2, self.w_qkv_bf16, self.b_qkv, out_dtype=jnp.bfloat16)  # (B*S, 3H)

        # Attention + fused overlap-average merge; output already in (B, S, H*D) order & bf16,
        # so no XLA transpose is needed on either side of the kernel.
        attn = pallas_sliding_attention(
            qkv, self.pos_bias_bf16, B=B, H=Hn, S=S, D=D, W=W, stride=stride,
            n_windows=n_windows, n_regular=n_regular, has_tail=has_tail)   # (B, S, hidden) bf16

        out = pallas_linear(attn.reshape(B * S, Hd), self.wo_bf16, self.bo,
                            out_dtype=jnp.float32)
        return out.reshape(B, S, Hd)

    # Pure-JAX f32 reference mirroring the PyTorch forward, for correctness checks.
    def reference(self, hidden_states):
        B, S, Hd = hidden_states.shape
        W, Hn, D = self.window_size, self.num_heads, self.head_dim
        x2 = hidden_states.reshape(B * S, Hd)
        q = (x2 @ self.wq + self.bq).reshape(B, S, Hn, D).transpose(0, 2, 1, 3)
        k = (x2 @ self.wk + self.bk).reshape(B, S, Hn, D).transpose(0, 2, 1, 3)
        v = (x2 @ self.wv + self.bv).reshape(B, S, Hn, D).transpose(0, 2, 1, 3)

        merge_starts = self._merge_starts(S)
        merged = jnp.zeros((B, Hn, S, D), jnp.float32)
        counts = jnp.zeros((S,), jnp.float32)
        for s0 in merge_starts:
            qc, kc, vc = q[:, :, s0:s0 + W], k[:, :, s0:s0 + W], v[:, :, s0:s0 + W]
            sc = jnp.einsum("bhqd,bhkd->bhqk", qc, kc) / math.sqrt(D) + self.pos_bias[None]
            p = jax.nn.softmax(sc, axis=-1)
            o = jnp.einsum("bhqk,bhkd->bhqd", p, vc)
            merged = merged.at[:, :, s0:s0 + W].add(o)
            counts = counts.at[s0:s0 + W].add(1.0)
        merged = merged / jnp.maximum(counts, 1.0)[None, None, :, None]
        ctx = merged.transpose(0, 2, 1, 3).reshape(B * S, Hd)
        return (ctx @ self.wo + self.bo).reshape(B, S, Hd)


if __name__ == "__main__":
    # Small shapes consistent with the module: B=2, S=64, hidden=32, heads=4 (head_dim=8),
    # window=32, stride=24  ->  S % stride != 0, so the tail-window branch is exercised and
    # windows overlap (overlap-average path exercised).
    B, S, HIDDEN, HEADS, WIN, STRIDE = 2, 64, 32, 4, 32, 24

    mod = SlidingWindowAttentionPallas(HIDDEN, HEADS, window_size=WIN, stride=STRIDE,
                                       key=jax.random.PRNGKey(0))
    x = jax.random.normal(jax.random.PRNGKey(0), (B, S, HIDDEN), jnp.float32)

    out = jax.block_until_ready(mod(x))
    ref = mod.reference(x)
    assert out.shape == (B, S, HIDDEN)
    err = float(jnp.max(jnp.abs(out - ref)))
    # bf16 MXU operands + approx reciprocal -> relaxed tolerance vs f32 reference.
    assert jnp.allclose(out, ref, rtol=5e-2, atol=5e-2), f"mismatch vs reference (max abs err {err})"

    print("KERNEL_OK")
</pallas_src>

<mosaic_0001>
module attributes {stable_mosaic.version = 11 : i64} {
  func.func @_linear_bias_kernel(%arg0: i32, %arg1: i32, %arg2: i32, %arg3: memref<128x32xbf16, #tpu.memory_space<vmem>>, %arg4: memref<32x96xbf16, #tpu.memory_space<vmem>>, %arg5: memref<1x96xf32, #tpu.memory_space<vmem>>, %arg6: memref<128x96xbf16, #tpu.memory_space<vmem>>, %arg7: memref<128x96xf32, #tpu.memory_space<vmem>>) attributes {dimension_semantics = [#tpu.dimension_semantics<parallel>, #tpu.dimension_semantics<parallel>, #tpu.dimension_semantics<arbitrary>], iteration_bounds = array<i64: 1, 1, 1>, scalar_prefetch = 0 : i64, scratch_operands = 1 : i64, tpu.core_type = #tpu.core_type<tc>, window_params = [{transform_indices = @transform_0, window_bounds = array<i64: 128, 32>}, {transform_indices = @transform_1, window_bounds = array<i64: 32, 96>}, {transform_indices = @transform_2, window_bounds = array<i64: 1, 96>}, {transform_indices = @transform_3, window_bounds = array<i64: 128, 96>}]} {
    %c0_i32 = arith.constant 0 : i32
    %0 = arith.cmpi eq, %arg2, %c0_i32 : i32
    %1 = arith.extui %0 : i1 to i32
    %c0_i32_0 = arith.constant 0 : i32
    %2 = arith.cmpi ne, %1, %c0_i32_0 : i32
    scf.if %2 {
      %cst_10 = arith.constant 0.000000e+00 : f32
      %12 = vector.broadcast %cst_10 : f32 to vector<128x96xf32>
      %c0_11 = arith.constant 0 : index
      %c0_12 = arith.constant 0 : index
      %13 = vector.load %arg7[%c0_11, %c0_12] : memref<128x96xf32, #tpu.memory_space<vmem>>, vector<128x96xf32>
      tpu.vector_store %arg7[%c0_11, %c0_12], %12 {strides = array<i32>} : memref<128x96xf32, #tpu.memory_space<vmem>>, vector<128x96xf32>,
    } else {
    }
    %c0 = arith.constant 0 : index
    %c0_1 = arith.constant 0 : index
    %3 = vector.load %arg7[%c0, %c0_1] : memref<128x96xf32, #tpu.memory_space<vmem>>, vector<128x96xf32>
    %c0_2 = arith.constant 0 : index
    %c0_3 = arith.constant 0 : index
    %4 = vector.load %arg3[%c0_2, %c0_3] : memref<128x32xbf16, #tpu.memory_space<vmem>>, vector<128x32xbf16>
    %c0_4 = arith.constant 0 : index
    %c0_5 = arith.constant 0 : index
    %5 = vector.load %arg4[%c0_4, %c0_5] : memref<32x96xbf16, #tpu.memory_space<vmem>>, vector<32x96xbf16>
    %cst = arith.constant dense<0.000000e+00> : vector<128x96xf32>
    %6 = tpu.matmul %4, %5, %cst {dimension_numbers = #tpu.dot_dimension_numbers<[1], [0], [0], [1], [0, 0, 1, 1], [], []>} : vector<128x32xbf16>, vector<32x96xbf16>, vector<128x96xf32> -> vector<128x96xf32>
    %7 = arith.addf %3, %6 : vector<128x96xf32>
    %c0_6 = arith.constant 0 : index
    %c0_7 = arith.constant 0 : index
    %8 = vector.load %arg7[%c0_6, %c0_7] : memref<128x96xf32, #tpu.memory_space<vmem>>, vector<128x96xf32>
    tpu.vector_store %arg7[%c0_6, %c0_7], %7 {strides = array<i32>} : memref<128x96xf32, #tpu.memory_space<vmem>>, vector<128x96xf32>,
    %c0_i32_8 = arith.constant 0 : i32
    %9 = arith.cmpi eq, %arg2, %c0_i32_8 : i32
    %10 = arith.extui %9 : i1 to i32
    %c0_i32_9 = arith.constant 0 : i32
    %11 = arith.cmpi ne, %10, %c0_i32_9 : i32
    scf.if %11 {
      %c0_10 = arith.constant 0 : index
      %c0_11 = arith.constant 0 : index
      %12 = vector.load %arg7[%c0_10, %c0_11] : memref<128x96xf32, #tpu.memory_space<vmem>>, vector<128x96xf32>
      %c0_12 = arith.constant 0 : index
      %c0_13 = arith.constant 0 : index
      %13 = vector.load %arg5[%c0_12, %c0_13] : memref<1x96xf32, #tpu.memory_space<vmem>>, vector<1x96xf32>
      %14 = vector.broadcast %13 : vector<1x96xf32> to vector<128x96xf32>
      %15 = arith.addf %12, %14 : vector<128x96xf32>
      %16 = arith.truncf %15 : vector<128x96xf32> to vector<128x96xbf16>
      %c0_14 = arith.constant 0 : index
      %c0_15 = arith.constant 0 : index
      %17 = vector.load %arg6[%c0_14, %c0_15] : memref<128x96xbf16, #tpu.memory_space<vmem>>, vector<128x96xbf16>
      tpu.vector_store %arg6[%c0_14, %c0_15], %16 {strides = array<i32>} : memref<128x96xbf16, #tpu.memory_space<vmem>>, vector<128x96xbf16>,
    } else {
    }
    return
  }
  func.func @transform_0(%arg0: i32, %arg1: i32, %arg2: i32) -> (i32, i32) {
    %c0_i32 = arith.constant 0 : i32
    return %arg0, %arg2 : i32, i32
  }
  func.func @transform_1(%arg0: i32, %arg1: i32, %arg2: i32) -> (i32, i32) {
    %c0_i32 = arith.constant 0 : i32
    return %arg2, %arg1 : i32, i32
  }
  func.func @transform_2(%arg0: i32, %arg1: i32, %arg2: i32) -> (i32, i32) {
    %c0_i32 = arith.constant 0 : i32
    %c0_i32_0 = arith.constant 0 : i32
    return %c0_i32, %arg1 : i32, i32
  }
  func.func @transform_3(%arg0: i32, %arg1: i32, %arg2: i32) -> (i32, i32) {
    %c0_i32 = arith.constant 0 : i32
    return %arg0, %arg1 : i32, i32
  }
}

</mosaic_0001>

<bundles_post_ra>
// kernel: tpu_custom_call.1
= control target key start
LH: loop header
LB: loop body
LE: loop exit
PB: predicated region body
PF: predicated region fallthrough
CT: control target
= control target key end

     0   :  { %vm19_vm0 = vcmask 785408   ;;  %v502_v1 = vmov 0.0   ;;  %vm124_vm1 = vcmask 261120   ;;  %vm385_vm2 = vcmask 781312   ;;  %s678_s1 = inlined_call_operand.vmem [shape: bf16[32,96], index: 1, kind: input, shape index: {}]   ;;  %s679_s0 = inlined_call_operand.vmem [shape: bf16[128,32], index: 0, kind: input, shape index: {}]   ;;  %s680_s2 = inlined_call_operand.vmem [shape: f32[1,96], index: 2, kind: input, shape index: {}]   ;;  %s681_s3 = inlined_call_operand.vmem [shape: bf16[128,96], index: 3, kind: output, shape index: {}]  }
   0x1   :  { %v492_v0 = vld [vmem:[%s678_s1] sm:$0xff]   ;;  %22 = vst.msk [vmem:[#allocation2 + $0x10] sm:$0xff] %vm19_vm0, %v502_v1  ;;  %20 = vst.msk [vmem:[#allocation2] sm:$0xff] %vm19_vm0, %v502_v1  ;;  %v493_v2 = vld [vmem:[%s678_s1 + $0x8] sm:$0xff]  }
   0x2   :  { %21 = vst.msk [vmem:[#allocation2 + $0x8] sm:$0xff] %vm19_vm0, %v502_v1  ;;  %23 = vst.msk [vmem:[#allocation2 + $0x18] sm:$0xff] %vm19_vm0, %v502_v1  ;;  %467 = vmatprep.subr.bf16.mxu0 %v492_v0  ;;  %487 = vmatprep.subr.bf16.mxu1 %v492_v0  ;;  %v494_v3 = vld [vmem:[%s679_s0] sm:$0xff]   ;;  %v496_v5 = vld [vmem:[%s679_s0 + $0x8] sm:$0xff]  }
   0x3   :  { %24 = vst.msk [vmem:[#allocation2 + $0x20] sm:$0xff] %vm19_vm0, %v502_v1  ;;  %25 = vst.msk [vmem:[#allocation2 + $0x28] sm:$0xff] %vm19_vm0, %v502_v1  ;;  %468 = vmatpush3.bf16.msra.mxu0 %v492_v0  ;;  %489 = vmatpush3.bf16.msra.mxu1 %v492_v0  ;;  %v495_v4 = vld [vmem:[%s679_s0 + $0x20] sm:$0xff]   ;;  %v497_v6 = vld [vmem:[%s679_s0 + $0x28] sm:$0xff]  }
   0x4   :  { %26 = vst.msk [vmem:[#allocation2 + $0x30] sm:$0xff] %vm19_vm0, %v502_v1  ;;  %27 = vst.msk [vmem:[#allocation2 + $0x38] sm:$0xff] %vm19_vm0, %v502_v1  ;;  %469 = vmatprep.subr.bf16.mxu0 %v493_v2  ;;  %488 = vmatprep.subr.bf16.mxu1 %v493_v2  ;;  %v498_v7 = vld [vmem:[%s679_s0 + $0x10] sm:$0xff]   ;;  %v500_v9 = vld [vmem:[%s679_s0 + $0x18] sm:$0xff]  }
   0x5   :  { %28 = vst.msk [vmem:[#allocation2 + $0x40] sm:$0xff] %vm19_vm0, %v502_v1  ;;  %29 = vst.msk [vmem:[#allocation2 + $0x48] sm:$0xff] %vm19_vm0, %v502_v1  ;;  %471 = vmatprep.mubr.msk.bf16.mxu0 %vm124_vm1, %v494_v3  ;;  %479 = vmatprep.mubr.msk.bf16.mxu1 %vm124_vm1, %v495_v4  ;;  %v499_v8 = vld [vmem:[%s679_s0 + $0x30] sm:$0xff]   ;;  %v501_v10 = vld [vmem:[%s679_s0 + $0x38] sm:$0xff]  }
   0x6   :  { %30 = vst.msk [vmem:[#allocation2 + $0x50] sm:$0xff] %vm19_vm0, %v502_v1  ;;  %31 = vst.msk [vmem:[#allocation2 + $0x58] sm:$0xff] %vm19_vm0, %v502_v1  ;;  %v588_v39 = vld [vmem:[%s680_s2] ss:$0 sm:$0xff] }
   0x7   :  { %32 = vst.msk [vmem:[#allocation2 + $0x60] sm:$0xff] %vm19_vm0, %v502_v1  ;;  %33 = vst.msk [vmem:[#allocation2 + $0x68] sm:$0xff] %vm19_vm0, %v502_v1  ;;  %470 = vmatpush3.bf16.msra.mxu0 %v493_v2  ;;  %490 = vmatpush3.bf16.msra.mxu1 %v493_v2 }
   0x8   :  { %34 = vst.msk [vmem:[#allocation2 + $0x70] sm:$0xff] %vm19_vm0, %v502_v1  ;;  %35 = vst.msk [vmem:[#allocation2 + $0x78] sm:$0xff] %vm19_vm0, %v502_v1  ;;  %v38_v11 = vld [vmem:[#allocation2 + $0x10] sm:$0xff]  ;;  %v36_v13 = vld [vmem:[#allocation2] sm:$0xff] }
   0x9   :  { %v39_v17 = vld [vmem:[#allocation2 + $0x18] sm:$0xff]  ;;  %v37_v23 = vld [vmem:[#allocation2 + $0x8] sm:$0xff] }
   0xa   :  { %472 = vmatmul.mubr.msk.bf16.vlgmr.msra.gmra.mrb[0].mxu0 %vm124_vm1, %v496_v5  ;;  %480 = vmatmul.mubr.msk.bf16.vlgmr.msra.gmra.mrb[0].mxu1 %vm124_vm1, %v497_v6  ;;  %v40_v37 = vld [vmem:[#allocation2 + $0x20] sm:$0xff]  ;;  %v41_v48 = vld [vmem:[#allocation2 + $0x28] sm:$0xff] }
   0xb   :  { %475 = vmatprep.mubr.msk.bf16.mxu0 %vm124_vm1, %v498_v7  ;;  %483 = vmatprep.mubr.msk.bf16.mxu1 %vm124_vm1, %v499_v8  ;;  %v42_v35 = vld [vmem:[#allocation2 + $0x30] sm:$0xff]  ;;  %v43_v42 = vld [vmem:[#allocation2 + $0x38] sm:$0xff] }
   0xc   :  { %v44_v14 = vld [vmem:[#allocation2 + $0x40] sm:$0xff]  ;;  %v45_v24 = vld [vmem:[#allocation2 + $0x48] sm:$0xff] }
   0xd   :  { %v46_v12 = vld [vmem:[#allocation2 + $0x50] sm:$0xff]  ;;  %v47_v18 = vld [vmem:[#allocation2 + $0x58] sm:$0xff] }
   0xe   :  { %v48_v38 = vld [vmem:[#allocation2 + $0x60] sm:$0xff]  ;;  %v49_v49 = vld [vmem:[#allocation2 + $0x68] sm:$0xff] }
   0xf   :  { %v50_v36 = vld [vmem:[#allocation2 + $0x70] sm:$0xff]  ;;  %v51_v43 = vld [vmem:[#allocation2 + $0x78] sm:$0xff] }
  0x12   :  { %476 = vmatmul.mubr.msk.bf16.gmra.mrb[4].mxu0 %vm124_vm1, %v500_v9  ;;  %484 = vmatmul.mubr.msk.bf16.gmra.mrb[4].mxu1 %vm124_vm1, %v501_v10 }
  0xdd   :  { %v473_v15 = vpop.f32.mrb[0].mxu0  ;;  %v481_v16 = vpop.f32.mrb[0].mxu1 }
  0xde   :  { %v248_v19 = vadd.f32 %v473_v15, %v38_v11  ;;  %v256_v20 = vadd.f32 %v481_v16, %v46_v12  ;;  %v183_v21 = vpop.f32.mrb[1].mxu0  ;;  %v215_v22 = vpop.f32.mrb[1].mxu1 }
  0xdf   :  { %v246_v25 = vadd.f32 %v183_v21, %v36_v13  ;;  %v254_v26 = vadd.f32 %v215_v22, %v44_v14  ;;  %v474_v27 = vpop.f32.mrb[2].mxu0  ;;  %v482_v28 = vpop.f32.mrb[2].mxu1 }
  0xe0   :  { %265 = vst.msk [vmem:[#allocation2 + $0x10] sm:$0xff] %vm19_vm0, %v248_v19  ;;  %273 = vst.msk [vmem:[#allocation2 + $0x50] sm:$0xff] %vm19_vm0, %v256_v20  ;;  %v249_v29 = vadd.f32 %v474_v27, %v39_v17  ;;  %v257_v30 = vadd.f32 %v482_v28, %v47_v18  ;;  %v186_v31 = vpop.f32.mrb[3].mxu0  ;;  %v218_v32 = vpop.f32.mrb[3].mxu1 }
  0xe1   :  { %263 = vst.msk [vmem:[#allocation2] sm:$0xff] %vm19_vm0, %v246_v25  ;;  %271 = vst.msk [vmem:[#allocation2 + $0x40] sm:$0xff] %vm19_vm0, %v254_v26  ;;  %v247_v33 = vadd.f32 %v186_v31, %v37_v23  ;;  %v255_v34 = vadd.f32 %v218_v32, %v45_v24 }
  0xe2   :  { %266 = vst.msk [vmem:[#allocation2 + $0x18] sm:$0xff] %vm19_vm0, %v249_v29  ;;  %274 = vst.msk [vmem:[#allocation2 + $0x58] sm:$0xff] %vm19_vm0, %v257_v30 }
  0xe3   :  { %264 = vst.msk [vmem:[#allocation2 + $0x8] sm:$0xff] %vm19_vm0, %v247_v33  ;;  %272 = vst.msk [vmem:[#allocation2 + $0x48] sm:$0xff] %vm19_vm0, %v255_v34 }
  0xe5   :  { %v477_v40 = vpop.f32.mrb[4].mxu0  ;;  %v485_v41 = vpop.f32.mrb[4].mxu1 }
  0xe6   :  { %v252_v44 = vadd.f32 %v477_v40, %v42_v35  ;;  %v260_v45 = vadd.f32 %v485_v41, %v50_v36  ;;  %v199_v46 = vpop.f32.mrb[5].mxu0  ;;  %v231_v47 = vpop.f32.mrb[5].mxu1 }
  0xe7   :  { %v284_v50 = vld [vmem:[#allocation2 + $0x10] sm:$0xff]  ;;  %v250_v52 = vadd.f32 %v199_v46, %v40_v37  ;;  %v258_v53 = vadd.f32 %v231_v47, %v48_v38  ;;  %v478_v54 = vpop.f32.mrb[6].mxu0  ;;  %v486_v55 = vpop.f32.mrb[6].mxu1 }
  0xe8   :  { %v292_v51 = vld [vmem:[#allocation2 + $0x50] sm:$0xff]  ;;  %v307_v56 = vadd.f32 %v588_v39, %v284_v50  ;;  %v282_v58 = vld [vmem:[#allocation2] sm:$0xff]  ;;  %269 = vst.msk [vmem:[#allocation2 + $0x30] sm:$0xff] %vm19_vm0, %v252_v44  ;;  %277 = vst.msk [vmem:[#allocation2 + $0x70] sm:$0xff] %vm19_vm0, %v260_v45  ;;  %v253_v60 = vadd.f32 %v478_v54, %v43_v42  ;;  %v261_v61 = vadd.f32 %v486_v55, %v51_v43  ;;  %v202_v62 = vpop.f32.mrb[7].mxu0  ;;  %v234_v63 = vpop.f32.mrb[7].mxu1 }
  0xe9   :  { %v315_v57 = vadd.f32 %v588_v39, %v292_v51  ;;  %v290_v59 = vld [vmem:[#allocation2 + $0x40] sm:$0xff]  ;;  %v305_v0 = vadd.f32 %v588_v39, %v282_v58  ;;  %v285_v2 = vld [vmem:[#allocation2 + $0x18] sm:$0xff]  ;;  %267 = vst.msk [vmem:[#allocation2 + $0x20] sm:$0xff] %vm19_vm0, %v250_v52  ;;  %275 = vst.msk [vmem:[#allocation2 + $0x60] sm:$0xff] %vm19_vm0, %v258_v53  ;;  %v251_v4 = vadd.f32 %v202_v62, %v41_v48 }
  0xea   :  { %v313_v1 = vadd.f32 %v588_v39, %v290_v59  ;;  %v293_v3 = vld [vmem:[#allocation2 + $0x58] sm:$0xff]  ;;  %v259_v5 = vadd.f32 %v234_v63, %v49_v49  ;;  %v443_v6 = vpack.c.bf16 %v307_v56, %v307_v56  ;;  %v308_v8 = vadd.f32 %v588_v39, %v285_v2  ;;  %v283_v10 = vld [vmem:[#allocation2 + $0x8] sm:$0xff]  ;;  %270 = vst.msk [vmem:[#allocation2 + $0x38] sm:$0xff] %vm19_vm0, %v253_v60 }
  0xeb   :  { %v451_v7 = vpack.c.bf16 %v315_v57, %v315_v57  ;;  %v316_v9 = vadd.f32 %v588_v39, %v293_v3  ;;  %v291_v11 = vld [vmem:[#allocation2 + $0x48] sm:$0xff]  ;;  %278 = vst.msk [vmem:[#allocation2 + $0x78] sm:$0xff] %vm19_vm0, %v261_v61  ;;  %v441_v12 = vpack.c.bf16 %v305_v0, %v305_v0  ;;  %v306_v14 = vadd.f32 %v588_v39, %v283_v10 }
  0xec   :  { %v449_v13 = vpack.c.bf16 %v313_v1, %v313_v1  ;;  %v314_v15 = vadd.f32 %v588_v39, %v291_v11  ;;  %268 = vst.msk [vmem:[#allocation2 + $0x28] sm:$0xff] %vm19_vm0, %v251_v4  ;;  %276 = vst.msk [vmem:[#allocation2 + $0x68] sm:$0xff] %vm19_vm0, %v259_v5  ;;  %v444_v16 = vpack.c.bf16 %v308_v8, %v308_v8 }
  0xed   :  { %388 = vst.msk [vmem:[%s681_s3 + $0x8] sm:$0xf] %vm385_vm2, %v443_v6  ;;  %396 = vst.msk [vmem:[%s681_s3 + $0x28] sm:$0xf] %vm385_vm2, %v451_v7  ;;  %v452_v17 = vpack.c.bf16 %v316_v9, %v316_v9  ;;  %v442_v18 = vpack.c.bf16 %v306_v14, %v306_v14 }
  0xee   :  { %386 = vst.msk [vmem:[%s681_s3] sm:$0xf] %vm385_vm2, %v441_v12  ;;  %394 = vst.msk [vmem:[%s681_s3 + $0x20] sm:$0xf] %vm385_vm2, %v449_v13  ;;  %v450_v19 = vpack.c.bf16 %v314_v15, %v314_v15 }
  0xef   :  { %389 = vst.msk [vmem:[%s681_s3 + $0xc] sm:$0xf] %vm385_vm2, %v444_v16  ;;  %397 = vst.msk [vmem:[%s681_s3 + $0x2c] sm:$0xf] %vm385_vm2, %v452_v17  ;;  %v288_v20 = vld [vmem:[#allocation2 + $0x30] sm:$0xff] }
  0xf0   :  { %387 = vst.msk [vmem:[%s681_s3 + $0x4] sm:$0xf] %vm385_vm2, %v442_v18  ;;  %395 = vst.msk [vmem:[%s681_s3 + $0x24] sm:$0xf] %vm385_vm2, %v450_v19  ;;  %v296_v21 = vld [vmem:[#allocation2 + $0x70] sm:$0xff]  ;;  %v311_v22 = vadd.f32 %v588_v39, %v288_v20  ;;  %v286_v24 = vld [vmem:[#allocation2 + $0x20] sm:$0xff] }
  0xf1   :  { %v319_v23 = vadd.f32 %v588_v39, %v296_v21  ;;  %v294_v25 = vld [vmem:[#allocation2 + $0x60] sm:$0xff]  ;;  %v309_v26 = vadd.f32 %v588_v39, %v286_v24  ;;  %v289_v28 = vld [vmem:[#allocation2 + $0x38] sm:$0xff] }
  0xf2   :  { %v317_v27 = vadd.f32 %v588_v39, %v294_v25  ;;  %v297_v29 = vld [vmem:[#allocation2 + $0x78] sm:$0xff]  ;;  %v447_v30 = vpack.c.bf16 %v311_v22, %v311_v22  ;;  %v312_v32 = vadd.f32 %v588_v39, %v289_v28 }
  0xf3   :  { %v455_v31 = vpack.c.bf16 %v319_v23, %v319_v23  ;;  %v320_v33 = vadd.f32 %v588_v39, %v297_v29  ;;  %v287_v34 = vld [vmem:[#allocation2 + $0x28] sm:$0xff]  ;;  %v445_v36 = vpack.c.bf16 %v309_v26, %v309_v26 }
  0xf4   :  { %v295_v35 = vld [vmem:[#allocation2 + $0x68] sm:$0xff]  ;;  %v453_v37 = vpack.c.bf16 %v317_v27, %v317_v27  ;;  %v310_v38 = vadd.f32 %v588_v39, %v287_v34  ;;  %392 = vst.msk [vmem:[%s681_s3 + $0x18] sm:$0xf] %vm385_vm2, %v447_v30  ;;  %v448_v41 = vpack.c.bf16 %v312_v32, %v312_v32 }
  0xf5   :  { %v318_v40 = vadd.f32 %v588_v39, %v295_v35  ;;  %400 = vst.msk [vmem:[%s681_s3 + $0x38] sm:$0xf] %vm385_vm2, %v455_v31  ;;  %v456_v42 = vpack.c.bf16 %v320_v33, %v320_v33  ;;  %390 = vst.msk [vmem:[%s681_s3 + $0x10] sm:$0xf] %vm385_vm2, %v445_v36 }
  0xf6   :  { %398 = vst.msk [vmem:[%s681_s3 + $0x30] sm:$0xf] %vm385_vm2, %v453_v37  ;;  %v446_v39 = vpack.c.bf16 %v310_v38, %v310_v38  ;;  %393 = vst.msk [vmem:[%s681_s3 + $0x1c] sm:$0xf] %vm385_vm2, %v448_v41 }
  0xf7   :  { %v454_v43 = vpack.c.bf16 %v318_v40, %v318_v40  ;;  %401 = vst.msk [vmem:[%s681_s3 + $0x3c] sm:$0xf] %vm385_vm2, %v456_v42 }
  0xf8   :  { %391 = vst.msk [vmem:[%s681_s3 + $0x14] sm:$0xf] %vm385_vm2, %v446_v39 }
  0xf9   :  { %399 = vst.msk [vmem:[%s681_s3 + $0x34] sm:$0xf] %vm385_vm2, %v454_v43 }

</bundles_post_ra>
